<compile_context>
chip_gen: v6e
topology: v6e:2x2x1
jax: 0.10.0
libtpu: 0.0.40
codegen_flags: <defaults>
</compile_context>

<pallas_src>
import functools

import jax
import jax.numpy as jnp
from jax.experimental import pallas as pl
from jax.experimental.pallas import tpu as pltpu


def _calibrated_loss_kernel(logit_ref, calib_ref, y_ref, out_ref, *, batch: int):
    """One batch tile: calibrate logits, per-row CE, masked partial sum."""
    i = pl.program_id(0)

    logit = logit_ref[...].astype(jnp.float32)     # [TB, C]
    calib = calib_ref[...]                         # [1, C]  f32 (grid-resident)
    y = y_ref[...]                                 # [TB, 1] int32

    tb, c = logit.shape

    out = logit - calib                            # calibrated logits [TB, C]

    # Numerically stable row-wise softmax cross entropy (VPU max + EUP exp).
    m = jnp.max(out, axis=-1, keepdims=True)       # [TB, 1]
    shifted = out - m                              # [TB, C]
    sumexp = jnp.sum(jnp.exp(shifted), axis=-1, keepdims=True)   # [TB, 1]

    # Gather shifted[i, y_i] via one-hot select (no dynamic vector gather on TPU).
    class_ids = jax.lax.broadcasted_iota(jnp.int32, (tb, c), 1)
    picked = jnp.sum(jnp.where(class_ids == y, shifted, 0.0),
                     axis=-1, keepdims=True)       # [TB, 1] == out[y] - m
    # loss_row = logsumexp(out) - out[y] = log(sumexp) - picked  (the m's cancel)
    loss_rows = jnp.log(sumexp) - picked           # [TB, 1]

    # Mask rows past the true batch size (last tile may extend past B).
    row_ids = i * tb + jax.lax.broadcasted_iota(jnp.int32, (tb, 1), 0)
    tile_sum = jnp.sum(jnp.where(row_ids < batch, loss_rows, 0.0))

    # Partial sum into this tile's own (8, 128)-aligned output block:
    # value at [0, 0], zeros elsewhere (wrapper sums everything).
    sub_ids = jax.lax.broadcasted_iota(jnp.int32, (8, 128), 0)
    lane_ids = jax.lax.broadcasted_iota(jnp.int32, (8, 128), 1)
    out_ref[...] = jnp.where((sub_ids == 0) & (lane_ids == 0), tile_sum, 0.0)


def _pick_batch_tile(b: int, c: int, itemsize: int) -> int:
    """Batch-tile rows: ~4 MiB per double-buffered logit block, multiple of 16."""
    target_bytes = 4 * 1024 * 1024
    tb = target_bytes // max(1, c * itemsize)
    tb = max(16, min(1024, (tb // 16) * 16))
    if b <= tb:
        return b              # single tile covering the whole (small) batch
    return tb


def calibrated_loss(logit: jax.Array, y: jax.Array, label_distrib: jax.Array,
                    tau: float) -> jax.Array:
    """Pallas implementation of CalibratedLoss.forward.

    Args:
      logit: [B, C] float logits (any float dtype; kept native in HBM).
      y: [B] integer class labels.
      label_distrib: [C] strictly-positive label distribution.
      tau: calibration scalar.
    Returns:
      scalar float32 loss (mean cross entropy over the batch).
    """
    b, c = logit.shape

    # Tiny [1, C] calibration vector, computed once (grid-invariant).
    calib = (tau * label_distrib.astype(jnp.float32) ** (-0.25)).reshape(1, c)
    y2d = y.astype(jnp.int32).reshape(b, 1)

    tb = _pick_batch_tile(b, c, jnp.dtype(logit.dtype).itemsize)
    num_tiles = pl.cdiv(b, tb)

    kernel = functools.partial(_calibrated_loss_kernel, batch=b)

    partials = pl.pallas_call(
        kernel,
        out_shape=jax.ShapeDtypeStruct((num_tiles * 8, 128), jnp.float32),
        grid=(num_tiles,),
        in_specs=[
            pl.BlockSpec((tb, c), lambda i: (i, 0)),    # logits, native dtype
            pl.BlockSpec((1, c), lambda i: (0, 0)),     # calib vector, resident
            pl.BlockSpec((tb, 1), lambda i: (i, 0)),    # labels
        ],
        out_specs=pl.BlockSpec((8, 128), lambda i: (i, 0)),
        compiler_params=pltpu.CompilerParams(
            dimension_semantics=("parallel",),
            vmem_limit_bytes=32 * 1024 * 1024,
        ),
    )(logit, calib, y2d)

    # TODO(synk): for LLM-vocab scale C (>= ~8K), additionally tile C with an
    # online (flash-style) logsumexp; not needed at these class counts.
    return jnp.sum(partials) / jnp.float32(b)


def _reference(logit, y, label_distrib, tau):
    out = logit - tau * label_distrib ** (-0.25)
    lse = jax.scipy.special.logsumexp(out, axis=-1)
    picked = jnp.take_along_axis(out, y[:, None], axis=-1)[:, 0]
    return jnp.mean(lse - picked)


if __name__ == "__main__":
    key = jax.random.PRNGKey(0)
    k1, k2, k3 = jax.random.split(key, 3)

    B, C = 8, 16       # batch of 8 samples, 16 classes
    tau = 0.5

    logit = jax.random.normal(k1, (B, C), dtype=jnp.float32)
    y = jax.random.randint(k2, (B,), 0, C, dtype=jnp.int32)
    # Label distribution: positive counts/probabilities (strictly > 0).
    label_distrib = jax.random.uniform(k3, (C,), minval=0.05, maxval=1.0,
                                       dtype=jnp.float32)

    loss = calibrated_loss(logit, y, label_distrib, tau)
    loss = jax.block_until_ready(loss)

    ref = _reference(logit, y, label_distrib, tau)
    assert jnp.allclose(loss, ref, atol=1e-5, rtol=1e-5), (loss, ref)

    print("KERNEL_OK")
</pallas_src>

<mosaic_0001>
module attributes {stable_mosaic.version = 11 : i64} {
  func.func @_calibrated_loss_kernel(%arg0: i32, %arg1: memref<8x16xf32, #tpu.memory_space<vmem>>, %arg2: memref<1x16xf32, #tpu.memory_space<vmem>>, %arg3: memref<8x1xi32, #tpu.memory_space<vmem>>, %arg4: memref<8x128xf32, #tpu.memory_space<vmem>>) attributes {dimension_semantics = [#tpu.dimension_semantics<parallel>], iteration_bounds = array<i64: 1>, scalar_prefetch = 0 : i64, scratch_operands = 0 : i64, tpu.core_type = #tpu.core_type<tc>, window_params = [{transform_indices = @transform_0, window_bounds = array<i64: 8, 16>}, {pipeline_mode = #tpu.pipeline_mode<synchronous>, transform_indices = @transform_1, window_bounds = array<i64: 1, 16>}, {transform_indices = @transform_2, window_bounds = array<i64: 8, 1>}, {transform_indices = @transform_3, window_bounds = array<i64: 8, 128>}]} {
    %c0 = arith.constant 0 : index
    %c0_0 = arith.constant 0 : index
    %0 = vector.load %arg1[%c0, %c0_0] : memref<8x16xf32, #tpu.memory_space<vmem>>, vector<8x16xf32>
    %c0_1 = arith.constant 0 : index
    %c0_2 = arith.constant 0 : index
    %1 = vector.load %arg2[%c0_1, %c0_2] : memref<1x16xf32, #tpu.memory_space<vmem>>, vector<1x16xf32>
    %c0_3 = arith.constant 0 : index
    %c0_4 = arith.constant 0 : index
    %2 = vector.load %arg3[%c0_3, %c0_4] : memref<8x1xi32, #tpu.memory_space<vmem>>, vector<8x1xi32>
    %3 = vector.broadcast %1 : vector<1x16xf32> to vector<8x16xf32>
    %4 = arith.subf %0, %3 : vector<8x16xf32>
    %cst = arith.constant dense<0xFF800000> : vector<8xf32>
    %5 = vector.multi_reduction <maximumf>, %4, %cst [1] : vector<8x16xf32> to vector<8xf32>
    %6 = vector.shape_cast %5 : vector<8xf32> to vector<8x1xf32>
    %7 = vector.broadcast %6 : vector<8x1xf32> to vector<8x16xf32>
    %8 = arith.subf %4, %7 : vector<8x16xf32>
    %9 = math.exp %8 : vector<8x16xf32>
    %cst_5 = arith.constant dense<0.000000e+00> : vector<8xf32>
    %10 = vector.multi_reduction <add>, %9, %cst_5 [1] : vector<8x16xf32> to vector<8xf32>
    %11 = vector.shape_cast %10 : vector<8xf32> to vector<8x1xf32>
    %12 = tpu.iota {dimensions = array<i32: 1>} : vector<8x16xi32>
    %13 = vector.broadcast %2 : vector<8x1xi32> to vector<8x16xi32>
    %14 = arith.cmpi eq, %12, %13 : vector<8x16xi32>
    %cst_6 = arith.constant 0.000000e+00 : f32
    %15 = vector.broadcast %cst_6 : f32 to vector<8x16xf32>
    %16 = arith.select %14, %8, %15 : vector<8x16xi1>, vector<8x16xf32>
    %cst_7 = arith.constant dense<0.000000e+00> : vector<8xf32>
    %17 = vector.multi_reduction <add>, %16, %cst_7 [1] : vector<8x16xf32> to vector<8xf32>
    %18 = vector.shape_cast %17 : vector<8xf32> to vector<8x1xf32>
    %19 = math.log %11 : vector<8x1xf32>
    %20 = arith.subf %19, %18 : vector<8x1xf32>
    %c8_i32 = arith.constant 8 : i32
    %21 = arith.muli %arg0, %c8_i32 : i32
    %22 = tpu.iota {dimensions = array<i32: 0>} : vector<8x1xi32>
    %23 = vector.broadcast %21 : i32 to vector<8x1xi32>
    %24 = arith.addi %23, %22 : vector<8x1xi32>
    %c8_i32_8 = arith.constant 8 : i32
    %25 = vector.broadcast %c8_i32_8 : i32 to vector<8x1xi32>
    %26 = arith.cmpi slt, %24, %25 : vector<8x1xi32>
    %cst_9 = arith.constant 0.000000e+00 : f32
    %27 = vector.broadcast %cst_9 : f32 to vector<8x1xf32>
    %28 = arith.select %26, %20, %27 : vector<8x1xi1>, vector<8x1xf32>
    %29 = vector.shape_cast %28 : vector<8x1xf32> to vector<1x8x1xf32>
    %cst_10 = arith.constant dense<0.000000e+00> : vector<1xf32>
    %30 = vector.multi_reduction <add>, %29, %cst_10 [1, 2] : vector<1x8x1xf32> to vector<1xf32>
    %31 = vector.shape_cast %30 : vector<1xf32> to vector<1x1x1xf32>
    %32 = vector.extract %31[0, 0, 0] : f32 from vector<1x1x1xf32>
    %33 = tpu.iota {dimensions = array<i32: 0>} : vector<8x128xi32>
    %34 = tpu.iota {dimensions = array<i32: 1>} : vector<8x128xi32>
    %c0_i32 = arith.constant 0 : i32
    %35 = vector.broadcast %c0_i32 : i32 to vector<8x128xi32>
    %36 = arith.cmpi eq, %33, %35 : vector<8x128xi32>
    %c0_i32_11 = arith.constant 0 : i32
    %37 = vector.broadcast %c0_i32_11 : i32 to vector<8x128xi32>
    %38 = arith.cmpi eq, %34, %37 : vector<8x128xi32>
    %39 = arith.andi %36, %38 : vector<8x128xi1>
    %cst_12 = arith.constant 0.000000e+00 : f32
    %40 = vector.broadcast %32 : f32 to vector<8x128xf32>
    %41 = vector.broadcast %cst_12 : f32 to vector<8x128xf32>
    %42 = arith.select %39, %40, %41 : vector<8x128xi1>, vector<8x128xf32>
    %c0_13 = arith.constant 0 : index
    %c0_14 = arith.constant 0 : index
    %43 = vector.load %arg4[%c0_13, %c0_14] : memref<8x128xf32, #tpu.memory_space<vmem>>, vector<8x128xf32>
    tpu.vector_store %arg4[%c0_13, %c0_14], %42 {strides = array<i32>} : memref<8x128xf32, #tpu.memory_space<vmem>>, vector<8x128xf32>,
    return
  }
  func.func @transform_0(%arg0: i32) -> (i32, i32) {
    %c0_i32 = arith.constant 0 : i32
    %c0_i32_0 = arith.constant 0 : i32
    return %arg0, %c0_i32 : i32, i32
  }
  func.func @transform_1(%arg0: i32) -> (i32, i32) {
    %c0_i32 = arith.constant 0 : i32
    %c0_i32_0 = arith.constant 0 : i32
    %c0_i32_1 = arith.constant 0 : i32
    return %c0_i32, %c0_i32_0 : i32, i32
  }
  func.func @transform_2(%arg0: i32) -> (i32, i32) {
    %c0_i32 = arith.constant 0 : i32
    %c0_i32_0 = arith.constant 0 : i32
    return %arg0, %c0_i32 : i32, i32
  }
  func.func @transform_3(%arg0: i32) -> (i32, i32) {
    %c0_i32 = arith.constant 0 : i32
    %c0_i32_0 = arith.constant 0 : i32
    return %arg0, %c0_i32 : i32, i32
  }
}

</mosaic_0001>

<bundles_post_ra>
// kernel: tpu_custom_call.1
= control target key start
LH: loop header
LB: loop body
LE: loop exit
PB: predicated region body
PF: predicated region fallthrough
CT: control target
= control target key end

     0   :  { %vm25_vm0 = vcmask 130048   ;;  %v118_v3 = vmov 0   ;;  %s155_s0 = inlined_call_operand.vmem [shape: f32[8,16], index: 0, kind: input, shape index: {}]   ;;  %s156_s1 = inlined_call_operand.vmem [shape: f32[1,16], index: 1, kind: input, shape index: {}]   ;;  %s157_s2 = inlined_call_operand.vmem [shape: s32[8,1], index: 2, kind: input, shape index: {}]   ;;  %s158_s3 = inlined_call_operand.hbm [shape: f32[8,128], index: 3, kind: output, shape index: {}]  }
   0x1   :  { %v15_v0 = vld [vmem:[%s155_s0] sm:$0xff]  ;;  %91 = vset.pattern.permute.xlu0 %v118_v3 }
   0x2   :  { %v86_v1 = vld [vmem:[%s156_s1] ss:$0 sm:$0xff] }
   0x3   :  { %v24_v2 = vsub.f32 %v15_v0, %v86_v1 }
   0x4   :  { %8 = vsyncpa [#allocation3], 0  ;;  %v17_v5 = vld [vmem:[%s157_s2] sm:$0xff]  ;;  %v35_v9 = vlaneseq  ;;  %vm55_vm2 = vcmask 7168   ;;  %s119_s0 = smov [#allocation2]  }
   0x5   :  { %v26_v4 = vsel %vm25_vm0, %v24_v2, -inf  ;;  %s78_s1 = sshll.u32 %s119_s0, 4  ;;  %s79_s1 = int_to_ptr.vmem [resolvable:$true] %s78_s1 }
   0x6   :  { %27 = vmax.xlane.f32.xlu0 %v26_v4  ;;  %v36_v10 = vand.u32 127, %v35_v9  ;;  %v50_v29 = vshrl.u32 %v35_v9, 7  ;;  %s96_s18 = scalar_lea.vmem %s79_s1, 128  ;;  %p101_p1 = scmp.lt.s32.totalorder %s79_s1, %s79_s1 }
   0x7   :  { %p97_p0 = scmp.ne.s32.totalorder %s79_s1, %s96_s18  ;;  %p102_p2 = scmp.lt.s32.totalorder %s96_s18, %s96_s18 }
   0x8   :  { %vm66_vm3 = vcmp.eq.s32.totalorder %v50_v29, 0  ;;  %vm67_vm4 = vcmp.eq.s32.totalorder %v36_v10, 0 }
   0x9   :  { %vm68_vm5 = vmand %vm66_vm3, %vm67_vm4  ;;  %p103_p3 = por %p102_p2, %p101_p1 }
   0xb   :  { %p104_p4 = pnand %p103_p3, %p97_p0 }
  0x1c   :  { %38 = vperm.xlu0 %91, %v17_v5  }
  0x8f   :  { %v28_v6 = vpop.xlane.xlu0 %27 }
  0x90   :  { %v29_v7 = vsub.f32 %v24_v2, %v28_v6 }
  0x92   :  { %v30_v8 = vmul.f32 1.442695, %v29_v7 }
  0x94   :  { %92 = vpow2.f32 %v30_v8 }
  0x97   :  { %v39_v11 = vpop.permute.xlu0 %38 }
  0x98   :  { %vm40_vm1 = vcmp.eq.s32.totalorder %v36_v10, %v39_v11 }
  0x99   :  { %v41_v14 = vsel %vm40_vm1, %v29_v7, 0.0 }
  0x9a   :  { %v42_v15 = vsel %vm25_vm0, %v41_v14, 0.0 }
  0xa1   :  { %v93_v12 = vpop.eup %92 }
  0xa2   :  { %v32_v13 = vsel %vm25_vm0, %v93_v12, 0.0 }
  0xa3   :  { %33 = vadd.xlane.f32.xlu1 %v32_v13 }
  0xa7   :  { %43 = vadd.xlane.f32.xlu1 %v42_v15 }
 0x12c   :  { %v34_v16 = vpop.xlane.xlu1 %33 }
 0x12d   :  { %94 = vlog2.f32 %v34_v16 }
 0x130   :  { %v44_v19 = vpop.xlane.xlu1 %43 }
 0x13a   :  { %v95_v17 = vpop.eup %94 }
 0x13b   :  { %v46_v18 = vmul.f32 0.6931472, %v95_v17 }
 0x13d   :  { %v47_v20 = vsub.f32 %v46_v18, %v44_v19 }
 0x13f   :  { %v56_v21 = vsel %vm55_vm2, %v47_v20, 0.0 }
 0x140   :  { %57 = vadd.xlane.f32.xlu1 %v56_v21 }
 0x1c9   :  { %v58_v22 = vpop.xlane.xlu1 %57 }
 0x1ca   :  { %v59_v23 = vrot.slane %v58_v22, 4 }
 0x1cc   :  { %v60_v24 = vadd.f32 %v59_v23, %v58_v22 }
 0x1ce   :  { %v61_v25 = vrot.slane %v60_v24, 2 }
 0x1d0   :  { %v62_v26 = vadd.f32 %v61_v25, %v60_v24 }
 0x1d2   :  { %v63_v27 = vrot.slane %v62_v26, 1 }
 0x1d4   :  { %v64_v28 = vadd.f32 %v63_v27, %v62_v26 }
 0x1d6   :  { %87 = vpush %v64_v28 }
 0x207   :  { %s88_s2 = spop %87 }
 0x208   :  { %v69_v30 = vstv %s88_s2 }
 0x209   :  { %v70_v31 = vsel %vm68_vm5, %v69_v30, 0.0 }
 0x20a   :  { %71 = vst [vmem:[#allocation2] sm:$0xff] %v70_v31 }
 0x20b   :  { %107 = shalt.err (!%p104_p4)
}
 0x20c   :  { %81 = dma.vmem_to_hbm [thread:$0]  %s79_s1, 128, %s158_s3, [#allocation3]  }
 0x20d   :  { %116 = dma.done.wait [#allocation3], 128  }
 0x20e   :  { %117 = vsyncadd [#allocation3], 4294967168 }
 0x20f   :  { %85 = vsyncpa [#allocation3], 1 }

</bundles_post_ra>
